<compile_context>
chip_gen: v6e
topology: v6e:2x2x1
jax: 0.10.0
libtpu: 0.0.40
codegen_flags: <defaults>
</compile_context>

<pallas_src>
import functools

import numpy as np

import jax
import jax.numpy as jnp
from jax import lax
from jax.experimental import pallas as pl
from jax.experimental.pallas import tpu as pltpu


_COMPUTE_DTYPE = jnp.float32   # flip to jnp.bfloat16 for native MXU on v5e/v6e/v7x


def _round_up(x, m):
    return -(-x // m) * m


# ----------------------------------------------------------------------------
# Host-side (init-time) lowering of Conv2d -> dense matmul
# ----------------------------------------------------------------------------
def _conv_to_matmul_np(w_oihw, H, W):
    """Dense M s.t. (nchw-flat input) @ M == nchw-flat VALID (stride-1) conv."""
    w = np.asarray(w_oihw, dtype=np.float32)
    Co, Ci, K, _ = w.shape
    Ho, Wo = H - K + 1, W - K + 1
    M = np.zeros((Ci * H * W, Co * Ho * Wo), dtype=np.float32)
    for co in range(Co):
        for ci in range(Ci):
            for dy in range(K):
                for dx in range(K):
                    for oy in range(Ho):
                        for ox in range(Wo):
                            M[ci * H * W + (oy + dy) * W + (ox + dx),
                              co * Ho * Wo + oy * Wo + ox] += w[co, ci, dy, dx]
    return M


def prepare_params(params, S1, S2, compute_dtype=_COMPUTE_DTYPE):
    """One-time host-side weight folding.

    Builds:
      w_conv : (S1*S1 + S2*S2 + 1, conv1_cols + n2) block-diagonal matmul doing
               conv1_1 (cols 0:n1) and conv2_1 (cols conv1_cols:conv1_cols+n2)
               in one MXU dot.  The last input row is driven by a constant-1
               column appended to x and carries both conv biases; it also puts
               a 1.0 in lane n1 so m12's bias row gets consumed downstream.
      m12    : (conv1_cols, F1) conv1_2 matmul with its bias folded in row n1.
      w_fc1/2/3, fc_bias (packed, kept f32).
    """
    w11 = np.asarray(params["w_c11"], np.float32)
    b11 = np.asarray(params["b_c11"], np.float32)
    w12 = np.asarray(params["w_c12"], np.float32)
    b12 = np.asarray(params["b_c12"], np.float32)
    w21 = np.asarray(params["w_c21"], np.float32)
    b21 = np.asarray(params["b_c21"], np.float32)

    C1a, _, K1a, _ = w11.shape
    H1a = S1 - K1a + 1
    C1b, _, K1b, _ = w12.shape
    H1b = H1a - K1b + 1
    C2a, _, K2a, _ = w21.shape
    H2a = S2 - K2a + 1

    D1, D2 = S1 * S1, S2 * S2
    n1 = C1a * H1a * H1a                       # conv1_1 flatten width
    n2 = C2a * H2a * H2a                       # conv2_1 flatten width (== flat2)
    F1 = C1b * H1b * H1b                       # conv1_2 flatten width (== flat1)
    conv1_cols = _round_up(n1 + 1, 128)        # lane-pad; +1 for the ones lane

    W = np.zeros((D1 + D2 + 1, conv1_cols + n2), np.float32)
    W[:D1, :n1] = _conv_to_matmul_np(w11, S1, S1)
    W[D1:D1 + D2, conv1_cols:conv1_cols + n2] = _conv_to_matmul_np(w21, S2, S2)
    W[D1 + D2, :n1] = np.repeat(b11, H1a * H1a)        # conv1_1 bias (folded)
    W[D1 + D2, n1] = 1.0                               # ones lane for conv1_2 bias
    W[D1 + D2, conv1_cols:conv1_cols + n2] = np.repeat(b21, H2a * H2a)

    M12 = np.zeros((conv1_cols, F1), np.float32)
    M12[:n1, :] = _conv_to_matmul_np(w12, H1a, H1a)
    M12[n1, :] = np.repeat(b12, H1b * H1b)             # conv1_2 bias (folded)

    fc_bias = np.concatenate([
        np.asarray(params["b_fc1"], np.float32).ravel(),
        np.asarray(params["b_fc2"], np.float32).ravel(),
        np.asarray(params["b_fc3"], np.float32).ravel()])[None, :]

    cdt = compute_dtype
    return {
        "w_conv": jnp.asarray(W, cdt),
        "m12": jnp.asarray(M12, cdt),
        "w_fc1": jnp.asarray(params["w_fc1"], cdt),
        "w_fc2": jnp.asarray(params["w_fc2"], cdt),
        "w_fc3": jnp.asarray(params["w_fc3"], cdt),
        "fc_bias": jnp.asarray(fc_bias, jnp.float32),   # elementwise stays f32
    }


# ----------------------------------------------------------------------------
# The fused Pallas kernel: whole forward pass, intermediates never leave vregs
# ----------------------------------------------------------------------------
def _fused_forward_kernel(x_ref, wconv_ref, m12_ref, wfc1_ref, wfc2_ref,
                          wfc3_ref, fcb_ref, slab_ref, *,
                          conv1_cols, flat1_dim, flat2_dim,
                          fc1_dim, fc2_dim, n_classes, slab_width):
    f32 = jnp.float32

    def mm(a, w_ref):
        w = w_ref[...]
        return jnp.dot(a.astype(w.dtype), w, preferred_element_type=f32)

    fcb = fcb_ref[...]                               # (1, fc1+fc2+n_classes) f32

    # conv1_1 + conv2_1 as ONE block-diagonal matmul; biases already folded in
    # via the ones-column of x (relu keeps the ones lane == 1.0).
    h = jnp.maximum(mm(x_ref[...], wconv_ref), 0.0)  # (TB, conv1_cols + flat2)
    h1 = h[:, :conv1_cols]                           # lane-aligned conv1_1 block
    flat2 = h[:, conv1_cols:conv1_cols + flat2_dim]  # torch mat2.view(-1, flat2)

    # conv1_2 (+ folded bias through the ones lane) + ReLU -> torch mat1 flatten
    flat1 = jnp.maximum(mm(h1, m12_ref), 0.0)        # (TB, flat1)

    # hidden = cat(flat1, flat2) -- built once, reused for fc1 AND the output.
    hidden = jnp.concatenate([flat1, flat2], axis=1)         # (TB, 108)

    z1 = jnp.maximum(mm(hidden, wfc1_ref) + fcb[:, :fc1_dim], 0.0)
    z2 = jnp.maximum(mm(z1, wfc2_ref)
                     + fcb[:, fc1_dim:fc1_dim + fc2_dim], 0.0)
    out = mm(z2, wfc3_ref) + fcb[:, fc1_dim + fc2_dim:
                                 fc1_dim + fc2_dim + n_classes]

    # log_softmax over dim=1 (exp/log go to the EUP slot).
    m = jnp.max(out, axis=1, keepdims=True)
    z = out - m
    logp = z - jnp.log(jnp.sum(jnp.exp(z), axis=1, keepdims=True))

    # Single lane-dense (TB, 128) slab store: [hidden | logp | zero pad].
    tb = hidden.shape[0]
    pad_w = slab_width - (flat1_dim + flat2_dim + n_classes)
    parts = [hidden, logp]
    if pad_w > 0:
        parts.append(jnp.zeros((tb, pad_w), f32))
    slab_ref[...] = jnp.concatenate(parts, axis=1)


def _pick_tile(B):
    if B <= 8:
        return B
    # Expose >= 2 grid steps so the "parallel" batch axis shards across the two
    # TensorCores on v7x; cap the tile so step overhead stays amortized while
    # per-step VMEM remains tiny on every generation.
    tb = _round_up(-(-B // 2), 8)
    return min(tb, 1024)


def cnn_match_forward(kparams, batch_matrix1, batch_matrix2):
    """Mirrors CNNMatchModel.forward: returns (log_softmax(out), hidden)."""
    B = batch_matrix1.shape[0]
    x1 = batch_matrix1.reshape(B, -1)        # unsqueeze(1) + NCHW flatten (Cin=1)
    x2 = batch_matrix2.reshape(B, -1)

    w_conv = kparams["w_conv"]
    m12 = kparams["m12"]
    w_fc1, w_fc2, w_fc3 = kparams["w_fc1"], kparams["w_fc2"], kparams["w_fc3"]
    fcb = kparams["fc_bias"]

    conv1_cols, F1 = m12.shape
    F2 = w_conv.shape[1] - conv1_cols
    C = w_fc3.shape[1]
    D_in = w_conv.shape[0]                    # D1 + D2 + 1 (ones column)
    HID = F1 + F2
    SLAB = _round_up(HID + C, 128)

    cdt = w_conv.dtype
    ones = jnp.ones((B, 1), cdt)
    # Cast x once here (not per grid step) and append the bias-folding ones col.
    x = jnp.concatenate([x1.astype(cdt), x2.astype(cdt), ones], axis=1)

    TB = _pick_tile(B)
    grid = pl.cdiv(B, TB)
    B_pad = grid * TB
    if B_pad != B:                            # ragged batch: pad, slice after
        x = jnp.pad(x, ((0, B_pad - B), (0, 0)))

    def bcast(arr):
        nd = arr.ndim
        return pl.BlockSpec(arr.shape, lambda i, _nd=nd: (0,) * _nd)

    kernel = functools.partial(
        _fused_forward_kernel,
        conv1_cols=conv1_cols, flat1_dim=F1, flat2_dim=F2,
        fc1_dim=w_fc1.shape[1], fc2_dim=w_fc2.shape[1],
        n_classes=C, slab_width=SLAB)

    slab = pl.pallas_call(
        kernel,
        out_shape=jax.ShapeDtypeStruct((B_pad, SLAB), jnp.float32),
        grid=(grid,),
        in_specs=[
            pl.BlockSpec((TB, D_in), lambda i: (i, 0)),
            bcast(w_conv), bcast(m12),
            bcast(w_fc1), bcast(w_fc2), bcast(w_fc3),
            bcast(fcb),
        ],
        out_specs=pl.BlockSpec((TB, SLAB), lambda i: (i, 0)),
        compiler_params=pltpu.CompilerParams(
            dimension_semantics=("parallel",)),
    )(x, w_conv, m12, w_fc1, w_fc2, w_fc3, fcb)

    hidden = slab[:B, :HID]
    logp = slab[:B, HID:HID + C]
    return logp, hidden


# ----------------------------------------------------------------------------
# Pure-JAX reference (sanity check only), using the raw torch-style params
# ----------------------------------------------------------------------------
def reference_forward(params, m1, m2):
    dn = ("NCHW", "OIHW", "NCHW")

    def conv(x, w, b):
        y = lax.conv_general_dilated(x, w, (1, 1), "VALID", dimension_numbers=dn)
        return jnp.maximum(y + b[None, :, None, None], 0.0)

    B = m1.shape[0]
    a1 = conv(conv(m1[:, None], params["w_c11"], params["b_c11"]),
              params["w_c12"], params["b_c12"]).reshape(B, -1)
    a2 = conv(m2[:, None], params["w_c21"], params["b_c21"]).reshape(B, -1)
    hidden = jnp.concatenate([a1, a2], axis=1)
    z1 = jnp.maximum(hidden @ params["w_fc1"] + params["b_fc1"][0], 0.0)
    z2 = jnp.maximum(z1 @ params["w_fc2"] + params["b_fc2"][0], 0.0)
    out = z2 @ params["w_fc3"] + params["b_fc3"][0]
    logp = out - jax.scipy.special.logsumexp(out, axis=1, keepdims=True)
    return logp, hidden


# ----------------------------------------------------------------------------
def init_params(key, cfg):
    (S1, S2, C1a, K1a, C1b, K1b, H1, C2a, K2a, H2) = cfg
    flat1 = C1b * (S1 - K1a - K1b + 2) ** 2
    flat2 = C2a * (S2 - K2a + 1) ** 2
    hidden_fc = H1 + H2
    keys = jax.random.split(key, 12)

    def w(k, shape, fan_in):
        return jax.random.normal(k, shape, jnp.float32) / jnp.sqrt(fan_in)

    params = {
        "w_c11": w(keys[0], (C1a, 1, K1a, K1a), K1a * K1a),
        "b_c11": w(keys[1], (C1a,), K1a * K1a),
        "w_c12": w(keys[2], (C1b, C1a, K1b, K1b), C1a * K1b * K1b),
        "b_c12": w(keys[3], (C1b,), C1a * K1b * K1b),
        "w_c21": w(keys[4], (C2a, 1, K2a, K2a), K2a * K2a),
        "b_c21": w(keys[5], (C2a,), K2a * K2a),
        # fc weights stored [in, out] (== torch Linear weight.T)
        "w_fc1": w(keys[6], (flat1 + flat2, hidden_fc), flat1 + flat2),
        "b_fc1": w(keys[7], (1, hidden_fc), flat1 + flat2),
        "w_fc2": w(keys[8], (hidden_fc, 16), hidden_fc),
        "b_fc2": w(keys[9], (1, 16), hidden_fc),
        "w_fc3": w(keys[10], (16, 2), 16),
        "b_fc3": w(keys[11], (1, 2), 16),
    }
    return params, flat1, flat2


if __name__ == "__main__":
    # Small config: CNNMatchModel(7, 5, 4, 3, 8, 3, 16, 4, 3, 16)
    cfg = (7, 5, 4, 3, 8, 3, 16, 4, 3, 16)
    S1, S2 = cfg[0], cfg[1]
    B = 2

    key = jax.random.PRNGKey(0)
    kp, k1, k2 = jax.random.split(key, 3)
    params, flat1, flat2 = init_params(kp, cfg)
    kparams = prepare_params(params, S1, S2)   # one-time host-side weight folding

    batch_matrix1 = jax.random.normal(k1, (B, S1, S1), jnp.float32)
    batch_matrix2 = jax.random.normal(k2, (B, S2, S2), jnp.float32)

    fwd = jax.jit(cnn_match_forward)
    logp, hidden = fwd(kparams, batch_matrix1, batch_matrix2)
    jax.block_until_ready((logp, hidden))

    # sanity check against a plain-JAX reference
    logp_ref, hidden_ref = reference_forward(params, batch_matrix1, batch_matrix2)
    assert logp.shape == (B, 2) and hidden.shape == (B, flat1 + flat2)
    assert jnp.allclose(hidden, hidden_ref, atol=1e-3, rtol=1e-3)
    assert jnp.allclose(logp, logp_ref, atol=1e-3, rtol=1e-3)

    print("KERNEL_OK")
</pallas_src>

<mosaic_0001>
module attributes {stable_mosaic.version = 11 : i64} {
  func.func @_fused_forward_kernel(%arg0: i32, %arg1: memref<2x75xf32, #tpu.memory_space<vmem>>, %arg2: memref<75x164xf32, #tpu.memory_space<vmem>>, %arg3: memref<128x72xf32, #tpu.memory_space<vmem>>, %arg4: memref<108x32xf32, #tpu.memory_space<vmem>>, %arg5: memref<32x16xf32, #tpu.memory_space<vmem>>, %arg6: memref<16x2xf32, #tpu.memory_space<vmem>>, %arg7: memref<1x50xf32, #tpu.memory_space<vmem>>, %arg8: memref<2x128xf32, #tpu.memory_space<vmem>>) attributes {dimension_semantics = [#tpu.dimension_semantics<parallel>], iteration_bounds = array<i64: 1>, scalar_prefetch = 0 : i64, scratch_operands = 0 : i64, tpu.core_type = #tpu.core_type<tc>, window_params = [{transform_indices = @transform_0, window_bounds = array<i64: 2, 75>}, {pipeline_mode = #tpu.pipeline_mode<synchronous>, transform_indices = @transform_1, window_bounds = array<i64: 75, 164>}, {pipeline_mode = #tpu.pipeline_mode<synchronous>, transform_indices = @transform_2, window_bounds = array<i64: 128, 72>}, {pipeline_mode = #tpu.pipeline_mode<synchronous>, transform_indices = @transform_3, window_bounds = array<i64: 108, 32>}, {pipeline_mode = #tpu.pipeline_mode<synchronous>, transform_indices = @transform_4, window_bounds = array<i64: 32, 16>}, {pipeline_mode = #tpu.pipeline_mode<synchronous>, transform_indices = @transform_5, window_bounds = array<i64: 16, 2>}, {pipeline_mode = #tpu.pipeline_mode<synchronous>, transform_indices = @transform_6, window_bounds = array<i64: 1, 50>}, {transform_indices = @transform_7, window_bounds = array<i64: 2, 128>}]} {
    %c0 = arith.constant 0 : index
    %c0_0 = arith.constant 0 : index
    %0 = vector.load %arg7[%c0, %c0_0] : memref<1x50xf32, #tpu.memory_space<vmem>>, vector<1x50xf32>
    %c0_1 = arith.constant 0 : index
    %c0_2 = arith.constant 0 : index
    %1 = vector.load %arg1[%c0_1, %c0_2] : memref<2x75xf32, #tpu.memory_space<vmem>>, vector<2x75xf32>
    %c0_3 = arith.constant 0 : index
    %c0_4 = arith.constant 0 : index
    %2 = vector.load %arg2[%c0_3, %c0_4] : memref<75x164xf32, #tpu.memory_space<vmem>>, vector<75x164xf32>
    %cst = arith.constant dense<0.000000e+00> : vector<2x164xf32>
    %3 = tpu.matmul %1, %2, %cst {dimension_numbers = #tpu.dot_dimension_numbers<[1], [0], [0], [1], [0, 0, 1, 1], [], []>} : vector<2x75xf32>, vector<75x164xf32>, vector<2x164xf32> -> vector<2x164xf32>
    %cst_5 = arith.constant 0.000000e+00 : f32
    %4 = vector.broadcast %cst_5 : f32 to vector<2x164xf32>
    %5 = arith.maximumf %3, %4 : vector<2x164xf32>
    %6 = vector.extract_strided_slice %5 {offsets = [0, 0], sizes = [2, 128], strides = [1, 1]} : vector<2x164xf32> to vector<2x128xf32>
    %7 = vector.extract_strided_slice %5 {offsets = [0, 128], sizes = [2, 36], strides = [1, 1]} : vector<2x164xf32> to vector<2x36xf32>
    %c0_6 = arith.constant 0 : index
    %c0_7 = arith.constant 0 : index
    %8 = vector.load %arg3[%c0_6, %c0_7] : memref<128x72xf32, #tpu.memory_space<vmem>>, vector<128x72xf32>
    %cst_8 = arith.constant dense<0.000000e+00> : vector<2x72xf32>
    %9 = tpu.matmul %6, %8, %cst_8 {dimension_numbers = #tpu.dot_dimension_numbers<[1], [0], [0], [1], [0, 0, 1, 1], [], []>} : vector<2x128xf32>, vector<128x72xf32>, vector<2x72xf32> -> vector<2x72xf32>
    %cst_9 = arith.constant 0.000000e+00 : f32
    %10 = vector.broadcast %cst_9 : f32 to vector<2x72xf32>
    %11 = arith.maximumf %9, %10 : vector<2x72xf32>
    %12 = tpu.concatenate %11, %7 in 1 : vector<2x72xf32>, vector<2x36xf32> -> vector<2x108xf32>
    %c0_10 = arith.constant 0 : index
    %c0_11 = arith.constant 0 : index
    %13 = vector.load %arg4[%c0_10, %c0_11] : memref<108x32xf32, #tpu.memory_space<vmem>>, vector<108x32xf32>
    %cst_12 = arith.constant dense<0.000000e+00> : vector<2x32xf32>
    %14 = tpu.matmul %12, %13, %cst_12 {dimension_numbers = #tpu.dot_dimension_numbers<[1], [0], [0], [1], [0, 0, 1, 1], [], []>} : vector<2x108xf32>, vector<108x32xf32>, vector<2x32xf32> -> vector<2x32xf32>
    %15 = vector.extract_strided_slice %0 {offsets = [0, 0], sizes = [1, 32], strides = [1, 1]} : vector<1x50xf32> to vector<1x32xf32>
    %16 = vector.broadcast %15 : vector<1x32xf32> to vector<2x32xf32>
    %17 = arith.addf %14, %16 : vector<2x32xf32>
    %cst_13 = arith.constant 0.000000e+00 : f32
    %18 = vector.broadcast %cst_13 : f32 to vector<2x32xf32>
    %19 = arith.maximumf %17, %18 : vector<2x32xf32>
    %c0_14 = arith.constant 0 : index
    %c0_15 = arith.constant 0 : index
    %20 = vector.load %arg5[%c0_14, %c0_15] : memref<32x16xf32, #tpu.memory_space<vmem>>, vector<32x16xf32>
    %cst_16 = arith.constant dense<0.000000e+00> : vector<2x16xf32>
    %21 = tpu.matmul %19, %20, %cst_16 {dimension_numbers = #tpu.dot_dimension_numbers<[1], [0], [0], [1], [0, 0, 1, 1], [], []>} : vector<2x32xf32>, vector<32x16xf32>, vector<2x16xf32> -> vector<2x16xf32>
    %22 = vector.extract_strided_slice %0 {offsets = [0, 32], sizes = [1, 16], strides = [1, 1]} : vector<1x50xf32> to vector<1x16xf32>
    %23 = vector.broadcast %22 : vector<1x16xf32> to vector<2x16xf32>
    %24 = arith.addf %21, %23 : vector<2x16xf32>
    %cst_17 = arith.constant 0.000000e+00 : f32
    %25 = vector.broadcast %cst_17 : f32 to vector<2x16xf32>
    %26 = arith.maximumf %24, %25 : vector<2x16xf32>
    %c0_18 = arith.constant 0 : index
    %c0_19 = arith.constant 0 : index
    %27 = vector.load %arg6[%c0_18, %c0_19] : memref<16x2xf32, #tpu.memory_space<vmem>>, vector<16x2xf32>
    %cst_20 = arith.constant dense<0.000000e+00> : vector<2x2xf32>
    %28 = tpu.matmul %26, %27, %cst_20 {dimension_numbers = #tpu.dot_dimension_numbers<[1], [0], [0], [1], [0, 0, 1, 1], [], []>} : vector<2x16xf32>, vector<16x2xf32>, vector<2x2xf32> -> vector<2x2xf32>
    %29 = vector.extract_strided_slice %0 {offsets = [0, 48], sizes = [1, 2], strides = [1, 1]} : vector<1x50xf32> to vector<1x2xf32>
    %30 = vector.broadcast %29 : vector<1x2xf32> to vector<2x2xf32>
    %31 = arith.addf %28, %30 : vector<2x2xf32>
    %cst_21 = arith.constant dense<0xFF800000> : vector<2xf32>
    %32 = vector.multi_reduction <maximumf>, %31, %cst_21 [1] : vector<2x2xf32> to vector<2xf32>
    %33 = vector.shape_cast %32 : vector<2xf32> to vector<2x1xf32>
    %34 = vector.broadcast %33 : vector<2x1xf32> to vector<2x2xf32>
    %35 = arith.subf %31, %34 : vector<2x2xf32>
    %36 = math.exp %35 : vector<2x2xf32>
    %cst_22 = arith.constant dense<0.000000e+00> : vector<2xf32>
    %37 = vector.multi_reduction <add>, %36, %cst_22 [1] : vector<2x2xf32> to vector<2xf32>
    %38 = vector.shape_cast %37 : vector<2xf32> to vector<2x1xf32>
    %39 = math.log %38 : vector<2x1xf32>
    %40 = vector.broadcast %39 : vector<2x1xf32> to vector<2x2xf32>
    %41 = arith.subf %35, %40 : vector<2x2xf32>
    %cst_23 = arith.constant 0.000000e+00 : f32
    %42 = vector.broadcast %cst_23 : f32 to vector<2x18xf32>
    %43 = tpu.concatenate %12, %41, %42 in 1 : vector<2x108xf32>, vector<2x2xf32>, vector<2x18xf32> -> vector<2x128xf32>
    %c0_24 = arith.constant 0 : index
    %c0_25 = arith.constant 0 : index
    %44 = vector.load %arg8[%c0_24, %c0_25] : memref<2x128xf32, #tpu.memory_space<vmem>>, vector<2x128xf32>
    tpu.vector_store %arg8[%c0_24, %c0_25], %43 {strides = array<i32>} : memref<2x128xf32, #tpu.memory_space<vmem>>, vector<2x128xf32>,
    return
  }
  func.func @transform_0(%arg0: i32) -> (i32, i32) {
    %c0_i32 = arith.constant 0 : i32
    %c0_i32_0 = arith.constant 0 : i32
    return %arg0, %c0_i32 : i32, i32
  }
  func.func @transform_1(%arg0: i32) -> (i32, i32) {
    %c0_i32 = arith.constant 0 : i32
    %c0_i32_0 = arith.constant 0 : i32
    %c0_i32_1 = arith.constant 0 : i32
    return %c0_i32, %c0_i32_0 : i32, i32
  }
  func.func @transform_2(%arg0: i32) -> (i32, i32) {
    %c0_i32 = arith.constant 0 : i32
    %c0_i32_0 = arith.constant 0 : i32
    %c0_i32_1 = arith.constant 0 : i32
    return %c0_i32, %c0_i32_0 : i32, i32
  }
  func.func @transform_3(%arg0: i32) -> (i32, i32) {
    %c0_i32 = arith.constant 0 : i32
    %c0_i32_0 = arith.constant 0 : i32
    %c0_i32_1 = arith.constant 0 : i32
    return %c0_i32, %c0_i32_0 : i32, i32
  }
  func.func @transform_4(%arg0: i32) -> (i32, i32) {
    %c0_i32 = arith.constant 0 : i32
    %c0_i32_0 = arith.constant 0 : i32
    %c0_i32_1 = arith.constant 0 : i32
    return %c0_i32, %c0_i32_0 : i32, i32
  }
  func.func @transform_5(%arg0: i32) -> (i32, i32) {
    %c0_i32 = arith.constant 0 : i32
    %c0_i32_0 = arith.constant 0 : i32
    %c0_i32_1 = arith.constant 0 : i32
    return %c0_i32, %c0_i32_0 : i32, i32
  }
  func.func @transform_6(%arg0: i32) -> (i32, i32) {
    %c0_i32 = arith.constant 0 : i32
    %c0_i32_0 = arith.constant 0 : i32
    %c0_i32_1 = arith.constant 0 : i32
    return %c0_i32, %c0_i32_0 : i32, i32
  }
  func.func @transform_7(%arg0: i32) -> (i32, i32) {
    %c0_i32 = arith.constant 0 : i32
    %c0_i32_0 = arith.constant 0 : i32
    return %arg0, %c0_i32 : i32, i32
  }
}

</mosaic_0001>

<bundles_post_ra>
// kernel: cnn_match_forward.1
= control target key start
LH: loop header
LB: loop body
LE: loop exit
PB: predicated region body
PF: predicated region fallthrough
CT: control target
= control target key end

     0   :  { %vm52_vm0 = vcmask 1042432   ;;  %v652_v3 = vmov 0.0   ;;  %vm48_vm1 = vcmask 613376   ;;  %vm653_vm2 = vmmov 0   ;;  %s654_s17 = smov 72   ;;  %s656_s16 = smov 80   ;;  %s922_s1 = inlined_call_operand.vmem [shape: f32[75,164], index: 1, kind: input, shape index: {}]   ;;  %s923_s2 = inlined_call_operand.vmem [shape: f32[128,72], index: 2, kind: input, shape index: {}]   ;;  %s924_s0 = inlined_call_operand.vmem [shape: f32[2,75], index: 0, kind: input, shape index: {}]   ;;  %s925_s3 = inlined_call_operand.vmem [shape: f32[108,32], index: 3, kind: input, shape index: {}]   ;;  %s926_s4 = inlined_call_operand.vmem [shape: f32[32,16], index: 4, kind: input, shape index: {}]   ;;  %s927_s6 = inlined_call_operand.vmem [shape: f32[1,50], index: 6, kind: input, shape index: {}]   ;;  %s928_s5 = inlined_call_operand.vmem [shape: f32[16,2], index: 5, kind: input, shape index: {}]   ;;  %s929_s7 = inlined_call_operand.vmem [shape: f32[2,128], index: 7, kind: output, shape index: {}]  }
   0x1   :  { %v47_v0 = vld [vmem:[%s922_s1 + $0x98] sm:$0x7]  ;;  %v46_v1 = vld [vmem:[%s922_s1 + $0x90] sm:$0x7]  ;;  %v45_v2 = vld [vmem:[%s922_s1 + $0x88] sm:$0xff]  ;;  %123 = vmatprep.mubr.f32.mxu0 %v652_v3  ;;  %558 = vmatprep.subr.mxu1 %v652_v3  ;;  %vm249_vm3 = vcmask 1043456  }
   0x2   :  { %510 = vmatprep.subr.msk.mxu0 %vm52_vm0, %v47_v0  ;;  %v44_v4 = vld [vmem:[%s922_s1 + $0x80] sm:$0xff]  ;;  %v43_v5 = vld [vmem:[%s922_s1 + $0x78] sm:$0xff]  ;;  %v42_v6 = vld [vmem:[%s922_s1 + $0x70] sm:$0xff]  ;;  %590 = vmatprep.mubr.msk.f32.mxu1 %vm653_vm2, %v652_v3  ;;  %vm223_vm4 = vcmask 588800   ;;  %vm245_vm5 = vcmask 883712   ;;  %vm331_vm6 = vcmask 261120  }
   0x3   :  { %511 = vmatpush1.msk.msra.mxu0 %vm52_vm0, %v46_v1  ;;  %v41_v7 = vld [vmem:[%s922_s1 + $0x68] sm:$0xff]  ;;  %v40_v8 = vld [vmem:[%s922_s1 + $0x60] sm:$0xff]  ;;  %v39_v9 = vld [vmem:[%s922_s1 + $0x58] sm:$0xff]  ;;  %vm411_vm7 = vcmask 130048   ;;  %vm485_vm8 = vcmask 9216   ;;  %vm503_vm9 = vcmask 900096  }
   0x4   :  { %73 = vmatprep.subr.mxu0 %v45_v2  ;;  %v38_v10 = vld [vmem:[%s922_s1 + $0x50] sm:$0xff]  ;;  %v147_v11 = vld [vmem:[%s923_s2 + $0x78] sm:$0xff]  ;;  %v37_v13 = vld [vmem:[%s922_s1 + $0x48] sm:$0xff] }
   0x5   :  { %74 = vmatpush1.msra.mxu0 %v44_v4  ;;  %v146_v12 = vld [vmem:[%s923_s2 + $0x70] sm:$0xff]  ;;  %559 = vmatpush3.msra.mxu1 %v147_v11  ;;  %v36_v14 = vld [vmem:[%s922_s1 + $0x40] sm:$0xff]  ;;  %v145_v15 = vld [vmem:[%s923_s2 + $0x68] sm:$0xff] }
   0x6   :  { %75 = vmatprep.subr.mxu0 %v43_v5  ;;  %560 = vmatprep.subr.mxu1 %v652_v3  ;;  %v35_v16 = vld [vmem:[%s922_s1 + $0x38] sm:$0xff]  ;;  %v34_v17 = vld [vmem:[%s922_s1 + $0x30] sm:$0xff]  ;;  %v144_v18 = vld [vmem:[%s923_s2 + $0x60] sm:$0xff] }
   0x7   :  { %76 = vmatpush1.msra.mxu0 %v42_v6  ;;  %561 = vmatpush3.msra.mxu1 %v146_v12  ;;  %v33_v19 = vld [vmem:[%s922_s1 + $0x28] sm:$0xff]  ;;  %v32_v20 = vld [vmem:[%s922_s1 + $0x20] sm:$0xff]  ;;  %v143_v21 = vld [vmem:[%s923_s2 + $0x58] sm:$0xff] }
   0x8   :  { %77 = vmatprep.subr.mxu0 %v41_v7  ;;  %562 = vmatprep.subr.mxu1 %v652_v3  ;;  %v31_v22 = vld [vmem:[%s922_s1 + $0x18] sm:$0xff]  ;;  %v30_v23 = vld [vmem:[%s922_s1 + $0x10] sm:$0xff]  ;;  %v29_v25 = vld [vmem:[%s922_s1 + $0x8] sm:$0xff] }
   0x9   :  { %78 = vmatpush1.msra.mxu0 %v40_v8  ;;  %563 = vmatpush3.msra.mxu1 %v145_v15  ;;  %v142_v24 = vld [vmem:[%s923_s2 + $0x50] sm:$0xff]  ;;  %v28_v26 = vld [vmem:[%s922_s1] sm:$0xff]  ;;  %v141_v27 = vld [vmem:[%s923_s2 + $0x48] sm:$0xff] }
   0xa   :  { %79 = vmatprep.subr.mxu0 %v39_v9  ;;  %564 = vmatprep.subr.mxu1 %v652_v3  ;;  %v27_v28 = vld [vmem:[%s924_s0] sm:$0x3]  ;;  %v139_v30 = vld [vmem:[%s923_s2 + $0x38] sm:$0xff]  ;;  %v138_v31 = vld [vmem:[%s923_s2 + $0x30] sm:$0xff]  ;;  %s655_s0 = smov 96  }
   0xb   :  { %80 = vmatpush1.msra.mxu0 %v38_v10  ;;  %565 = vmatpush3.msra.mxu1 %v144_v18  ;;  %v140_v29 = vld [vmem:[%s923_s2 + $0x40] sm:$0xff]  ;;  %v137_v32 = vld [vmem:[%s923_s2 + $0x28] sm:$0xff]  ;;  %v135_v34 = vld [vmem:[%s923_s2 + $0x18] sm:$0xff] }
   0xc   :  { %81 = vmatprep.subr.mxu0 %v37_v13  ;;  %566 = vmatprep.subr.mxu1 %v652_v3  ;;  %v136_v33 = vld [vmem:[%s923_s2 + $0x20] sm:$0xff]  ;;  %v134_v35 = vld [vmem:[%s923_s2 + $0x10] sm:$0xff]  ;;  %v133_v36 = vld [vmem:[%s923_s2 + $0x8] sm:$0xff] }
   0xd   :  { %82 = vmatpush1.msra.mxu0 %v36_v14  ;;  %567 = vmatpush3.msra.mxu1 %v143_v21  ;;  %v132_v37 = vld [vmem:[%s923_s2] sm:$0xff]  ;;  %v238_v38 = vld [vmem:[%s925_s3 + $0x68] sm:$0xf]  ;;  %v236_v40 = vld [vmem:[%s925_s3 + $0x58] sm:$0xff] }
   0xe   :  { %83 = vmatprep.subr.mxu0 %v35_v16  ;;  %568 = vmatprep.subr.mxu1 %v652_v3  ;;  %v237_v39 = vld [vmem:[%s925_s3 + $0x60] sm:$0xff]  ;;  %v235_v41 = vld [vmem:[%s925_s3 + $0x50] sm:$0xff]  ;;  %v234_v42 = vld [vmem:[%s925_s3 + $0x48] sm:$0xff] }
   0xf   :  { %84 = vmatpush1.msra.mxu0 %v34_v17  ;;  %569 = vmatpush3.msra.mxu1 %v142_v24  ;;  %v233_v44 = vld [vmem:[%s925_s3 + $0x40] sm:$0xff]  ;;  %v232_v47 = vld [vmem:[%s925_s3 + $0x38] sm:$0xff]  ;;  %v231_v49 = vld [vmem:[%s925_s3 + $0x30] sm:$0xff] }
  0x10   :  { %85 = vmatprep.subr.mxu0 %v33_v19  ;;  %570 = vmatprep.subr.mxu1 %v652_v3  ;;  %v230_v50 = vld [vmem:[%s925_s3 + $0x28] sm:$0xff]  ;;  %v229_v51 = vld [vmem:[%s925_s3 + $0x20] sm:$0xff]  ;;  %v228_v52 = vld [vmem:[%s925_s3 + $0x18] sm:$0xff] }
  0x11   :  { %86 = vmatpush1.msra.mxu0 %v32_v20  ;;  %571 = vmatpush3.msra.mxu1 %v141_v27  ;;  %v227_v53 = vld [vmem:[%s925_s3 + $0x10] sm:$0xff]  ;;  %v226_v54 = vld [vmem:[%s925_s3 + $0x8] sm:$0xff]  ;;  %v225_v55 = vld [vmem:[%s925_s3] sm:$0xff] }
  0x12   :  { %87 = vmatprep.subr.mxu0 %v31_v22  ;;  %572 = vmatprep.subr.mxu1 %v652_v3  ;;  %v327_v56 = vld [vmem:[%s926_s4 + $0x18] sm:$0xff]  ;;  %v326_v62 = vld [vmem:[%s926_s4 + $0x10] sm:$0xff]  ;;  %v325_v63 = vld [vmem:[%s926_s4 + $0x8] sm:$0xff] }
  0x13   :  { %88 = vmatpush1.msra.mxu0 %v30_v23  ;;  %573 = vmatpush3.msra.mxu1 %v140_v29  ;;  %v324_v0 = vld [vmem:[%s926_s4] sm:$0xff]  ;;  %v407_v7 = vld [vmem:[%s928_s5 + $0x8] sm:$0xff] }
  0x14   :  { %89 = vmatprep.subr.mxu0 %v29_v25  ;;  %574 = vmatprep.subr.mxu1 %v652_v3  ;;  %v513_v1 = vld [vmem:[%s927_s6] ss:$0 sm:$0xff] }
  0x15   :  { %90 = vmatpush1.msra.mxu0 %v28_v26  ;;  %575 = vmatpush3.msra.mxu1 %v139_v30  ;;  %v406_v8 = vld [vmem:[%s928_s5] sm:$0xff]  ;;  %s657_s5 = smov 108  }
  0x16   :  { %512 = vmatmul.mubr.msk.f32.vlgmr.msra.gmra.mxu0 %vm48_vm1, %v27_v28  ;;  %593 = vmatprep.subr.mxu0 %v652_v3 }
  0x17   :  { %576 = vmatprep.subr.mxu1 %v652_v3  ;;  %621 = vmatprep.mubr.msk.f32.mxu0 %vm653_vm2, %v652_v3 }
  0x18   :  { %577 = vmatpush3.msra.mxu1 %v138_v31  ;;  %594 = vmatpush3.msk.msra.mxu0 %vm249_vm3, %v238_v38 }
  0x19   :  { %578 = vmatprep.subr.mxu1 %v652_v3  ;;  %595 = vmatprep.subr.mxu0 %v652_v3 }
  0x1a   :  { %579 = vmatpush3.msra.mxu1 %v137_v32  ;;  %596 = vmatpush3.msra.mxu0 %v237_v39 }
  0x1b   :  { %580 = vmatprep.subr.mxu1 %v652_v3  ;;  %597 = vmatprep.subr.mxu0 %v652_v3 }
  0x1c   :  { %581 = vmatpush3.msra.mxu1 %v136_v33  ;;  %598 = vmatpush3.msra.mxu0 %v236_v40 }
  0x1d   :  { %582 = vmatprep.subr.mxu1 %v652_v3  ;;  %599 = vmatprep.subr.mxu0 %v652_v3 }
  0x1e   :  { %583 = vmatpush3.msra.mxu1 %v135_v34  ;;  %600 = vmatpush3.msra.mxu0 %v235_v41 }
  0x1f   :  { %584 = vmatprep.subr.mxu1 %v652_v3  ;;  %601 = vmatprep.subr.mxu0 %v652_v3 }
  0x20   :  { %585 = vmatpush3.msra.mxu1 %v134_v35  ;;  %602 = vmatpush3.msra.mxu0 %v234_v42 }
  0x21   :  { %586 = vmatprep.subr.mxu1 %v652_v3  ;;  %603 = vmatprep.subr.mxu0 %v652_v3 }
  0x22   :  { %587 = vmatpush3.msra.mxu1 %v133_v36  ;;  %604 = vmatpush3.msra.mxu0 %v233_v44 }
  0x23   :  { %588 = vmatprep.subr.mxu1 %v652_v3  ;;  %605 = vmatprep.subr.mxu0 %v652_v3 }
  0x24   :  { %589 = vmatpush3.msra.mxu1 %v132_v37  ;;  %606 = vmatpush3.msra.mxu0 %v232_v47 }
  0x25   :  { %624 = vmatprep.subr.mxu1 %v652_v3  ;;  %607 = vmatprep.subr.mxu0 %v652_v3 }
  0x26   :  { %608 = vmatpush3.msra.mxu0 %v231_v49  ;;  %408 = vrot.lane.b32.xlu1 %v513_v1, %s656_s16 }
  0x27   :  { %609 = vmatprep.subr.mxu0 %v652_v3 }
  0x28   :  { %610 = vmatpush3.msra.mxu0 %v230_v50 }
  0x29   :  { %611 = vmatprep.subr.mxu0 %v652_v3 }
  0x2a   :  { %612 = vmatpush3.msra.mxu0 %v229_v51 }
  0x2b   :  { %613 = vmatprep.subr.mxu0 %v652_v3 }
  0x2c   :  { %614 = vmatpush3.msra.mxu0 %v228_v52 }
  0x2d   :  { %615 = vmatprep.subr.mxu0 %v652_v3 }
  0x2e   :  { %616 = vmatpush3.msra.mxu0 %v227_v53 }
  0x2f   :  { %617 = vmatprep.subr.mxu0 %v652_v3 }
  0x30   :  { %618 = vmatpush3.msra.mxu0 %v226_v54 }
  0x31   :  { %619 = vmatprep.subr.mxu0 %v652_v3 }
  0x32   :  { %620 = vmatpush3.msra.mxu0 %v225_v55 }
  0x98   :  { %v409_v14 = vpop.permute.xlu1 %408 }
  0xd6   :  { %v125_v43 = vpop.f32.mrf.mxu0 }
  0xd7   :  { %v130_v45 = vmax.f32 %v125_v43, 0.0 }
  0xd8   :  { %v127_v46 = vpop.f32.mrf.mxu0 }
  0xd9   :  { %v131_v48 = vmax.f32 %v127_v46, 0.0  ;;  %591 = vmatmul.mubr.f32.vlgmr.msra.gmra.mxu1 %v130_v45 }
  0xda   :  { %632 = vmatprep.mubr.msk.f32.mxu1 %vm653_vm2, %v652_v3  ;;  %625 = vmatpush3.msra.mxu1 %v327_v56 }
  0xdb   :  { %220 = vrot.lane.b32.xlu0 %v131_v48, %s654_s17  ;;  %626 = vmatprep.subr.mxu1 %v652_v3 }
  0xdc   :  { %627 = vmatpush3.msra.mxu1 %v326_v62 }
  0xdd   :  { %628 = vmatprep.subr.mxu1 %v652_v3 }
  0xde   :  { %629 = vmatpush3.msra.mxu1 %v325_v63 }
  0xdf   :  { %630 = vmatprep.subr.mxu1 %v652_v3  ;;  %328 = vrot.lane.b32.xlu0 %v513_v1, %s655_s0 }
  0xe0   :  { %631 = vmatpush3.msra.mxu1 %v324_v0 }
  0xe1   :  { %635 = vmatprep.subr.mxu1 %v652_v3 }
 0x14d   :  { %v221_v59 = vpop.permute.xlu0 %220 }
 0x151   :  { %v329_v9 = vpop.permute.xlu0 %328 }
 0x199   :  { %v214_v57 = vpop.f32.mrf.mxu1 }
 0x19a   :  { %v218_v58 = vmax.f32 %v214_v57, 0.0 }
 0x19b   :  { %v592_v60 = vpop.f32.mrf.mxu1 }
 0x19c   :  { %v224_v61 = vsel %vm223_vm4, %v218_v58, %v221_v59 }
 0x19d   :  { %622 = vmatmul.mubr.msk.f32.vlgmr.msra.gmra.mxu0 %vm245_vm5, %v224_v61 }
 0x25d   :  { %v319_v2 = vpop.f32.mrf.mxu0 }
 0x25e   :  { %v320_v4 = vadd.f32 %v513_v1, %v319_v2 }
 0x25f   :  { %v623_v5 = vpop.f32.mrf.mxu0 }
 0x260   :  { %v323_v6 = vmax.f32 %v320_v4, 0.0 }
 0x262   :  { %633 = vmatmul.mubr.msk.f32.vlgmr.msra.gmra.mxu1 %vm331_vm6, %v323_v6 }
 0x263   :  { %639 = vmatprep.mubr.msk.f32.mxu1 %vm653_vm2, %v652_v3  ;;  %636 = vmatpush3.msra.mxu1 %v407_v7 }
 0x264   :  { %637 = vmatprep.subr.mxu1 %v652_v3 }
 0x265   :  { %638 = vmatpush3.msra.mxu1 %v406_v8 }
 0x322   :  { %v401_v10 = vpop.f32.mrf.mxu1 }
 0x323   :  { %v402_v11 = vadd.f32 %v401_v10, %v329_v9 }
 0x324   :  { %v634_v12 = vpop.f32.mrf.mxu1 }
 0x325   :  { %v405_v13 = vmax.f32 %v402_v11, 0.0 }
 0x327   :  { %640 = vmatmul.mubr.msk.f32.vlgmr.msra.gmra.mxu1 %vm411_vm7, %v405_v13 }
 0x3e7   :  { %v481_v15 = vpop.f32.mrf.mxu1 }
 0x3e8   :  { %v482_v16 = vadd.f32 %v481_v15, %v409_v14 }
 0x3e9   :  { %v641_v17 = vpop.f32.mrf.mxu1 }
 0x3ea   :  { %v486_v3 = vsel %vm485_vm8, %v482_v16, -inf }
 0x3eb   :  { %487 = vmax.xlane.f32.xlu1 %v486_v3 }
 0x474   :  { %v488_v18 = vpop.xlane.xlu1 %487 }
 0x475   :  { %v489_v19 = vsub.f32 %v482_v16, %v488_v18 }
 0x477   :  { %v490_v20 = vmul.f32 1.442695, %v489_v19 }
 0x479   :  { %648 = vpow2.f32 %v490_v20 }
 0x486   :  { %v649_v21 = vpop.eup %648 }
 0x487   :  { %v492_v22 = vsel %vm485_vm8, %v649_v21, 0.0 }
 0x488   :  { %493 = vadd.xlane.f32.xlu0 %v492_v22 }
 0x511   :  { %v494_v23 = vpop.xlane.xlu0 %493 }
 0x512   :  { %650 = vlog2.f32 %v494_v23 }
 0x51f   :  { %v651_v24 = vpop.eup %650 }
 0x520   :  { %v496_v25 = vmul.f32 0.6931472, %v651_v24 }
 0x522   :  { %v497_v26 = vsub.f32 %v489_v19, %v496_v25 }
 0x524   :  { %499 = vrot.lane.b32.xlu0 %v497_v26, %s657_s5 }
 0x596   :  { %v500_v27 = vpop.permute.xlu0 %499 }
 0x597   :  { %v502_v28 = vsel %vm245_vm5, %v224_v61, %v500_v27 }
 0x598   :  { %v504_v29 = vsel %vm503_vm9, %v502_v28, 0.0 }
 0x599   :  { %505 = vst [vmem:[%s929_s7] sm:$0x3] %v504_v29 }

</bundles_post_ra>
